<compile_context>
chip_gen: v7x
topology: tpu7x:2x2x1
jax: 0.10.0
libtpu: 0.0.40
codegen_flags: <defaults>
</compile_context>

<pallas_src>
import jax
import jax.numpy as jnp
import numpy as np
from jax.experimental import pallas as pl
from jax.experimental.pallas import tpu as pltpu


def _round_up(n, m):
    return ((n + m - 1) // m) * m


def _sublane_align(*dtypes):
    """Second-to-last-dim alignment: 8 for 32-bit, 16 for 16-bit, 32 for 8-bit."""
    bits = min(jnp.dtype(d).itemsize * 8 for d in dtypes)
    return max(8, 256 // bits)


def _choose_batch_tile(B, align, target=1024):
    """Even number of roughly-equal tiles (balances the 2 TCs on v7x), ~<=1024 rows."""
    if B <= 128:
        return _round_up(B, align)
    n_tiles = 2 * (-(-B // (2 * target)))          # even tile count
    return _round_up(-(-B // n_tiles), align)


def _make_mlp_kernel(num_inputs, num_layers, bias_widths, compute_dtype):
    """Fused MLP.  Ref order: x_0..x_{n-1}, w1_0..w1_{n-1}, biases, w_1..w_{L-1}, out."""

    def kernel(*refs):
        x_refs = refs[:num_inputs]
        w1_refs = refs[num_inputs:2 * num_inputs]
        b_ref = refs[2 * num_inputs]
        w_refs = refs[2 * num_inputs + 1:-1]
        o_ref = refs[-1]

        def mm(a, w_ref):
            # MXU matmul in compute_dtype, f32 accumulation.
            return jnp.dot(a.astype(compute_dtype), w_ref[...],
                           preferred_element_type=jnp.float32)

        # Layer 0 (single matmul in the concat path; row-block split for wide inputs).
        h = mm(x_refs[0][...], w1_refs[0])
        for i in range(1, num_inputs):
            h = h + mm(x_refs[i][...], w1_refs[i])
        h = h + b_ref[0:1, :bias_widths[0]]                # bias add in f32

        # Hidden layers carry a ReLU into the next matmul; the last layer is fc_out.
        for l in range(1, num_layers):
            h = jnp.maximum(h, 0.0)                        # ReLU of previous layer (VPU)
            h = mm(h, w_refs[l - 1]) + b_ref[l:l + 1, :bias_widths[l]]

        o_ref[...] = h.astype(o_ref.dtype)

    return kernel


def prepare_params(params, input_dims, *, lane_pad=128,
                   compute_dtype=jnp.bfloat16, split_first=False):
    """Zero-pad feature dims to `lane_pad`, cast weights to compute_dtype,
    optionally split W1 per input, and pack all biases into one f32 operand."""
    input_dims = [int(d) for d in input_dims]
    num_layers = len(params)

    out_dims = [int(w.shape[1]) for (w, _) in params]
    out_pads = [_round_up(d, lane_pad) for d in out_dims]
    max_pad = max(out_pads)

    # Layer-0 weight, optionally split across the (un-concatenated) inputs.
    w1, _ = params[0]
    h1, h1p = out_dims[0], out_pads[0]
    if split_first:
        offs = np.cumsum([0] + input_dims)
        pieces = [w1[offs[i]:offs[i + 1], :] for i in range(len(input_dims))]
    else:
        pieces = [w1]
    w1_list = [jnp.pad(p, ((0, 0), (0, h1p - h1))).astype(compute_dtype) for p in pieces]

    # Remaining layers: pad both dims (padded weight rows meet exactly-zero activations).
    rest = []
    prev_pad = h1p
    for l in range(1, num_layers):
        w, _ = params[l]
        d_in, d_out = w.shape
        wp = jnp.pad(w, ((0, prev_pad - d_in), (0, out_pads[l] - d_out)))
        rest.append(wp.astype(compute_dtype))
        prev_pad = out_pads[l]

    # All biases packed into one (rows, max_pad) f32 operand (fewer tiny DMAs).
    b_rows = _round_up(num_layers, 8)
    biases = jnp.zeros((b_rows, max_pad), jnp.float32)
    for l, (_, b) in enumerate(params):
        bvec = jnp.reshape(b, (-1,)).astype(jnp.float32)
        biases = biases.at[l, :out_dims[l]].set(bvec)

    return w1_list, rest, biases, out_pads


def rnd_predictor_forward(x_list, params, *, dim_output, batch_tile=None,
                          compute_dtype=jnp.bfloat16, out_dtype=None,
                          lane_pad=128, concat_threshold=128, unpad_output=True):
    """Pallas forward of RNDPredictorNetwork.

    x_list : list of [B, d_i] arrays (the torch module concatenates them on dim -1).
    params : list of (W, b) with W stored [D_in, D_out] (transposed vs torch).
    """
    input_dims = [int(x.shape[-1]) for x in x_list]
    B = int(x_list[0].shape[0])
    d_total = sum(input_dims)

    # Small total feature dim: one K<=128 matmul beats N split matmuls; the concat is
    # a cheap wrapper op.  Wide inputs keep the split (no HBM round trip of a concat).
    split_first = (d_total > concat_threshold) and (len(x_list) > 1)
    if not split_first and len(x_list) > 1:
        xs = [jnp.concatenate(x_list, axis=-1)]
        xdims = [d_total]
    else:
        xs = list(x_list)
        xdims = input_dims
    # Inputs stay in their native dtype; the kernel casts to compute_dtype.

    if out_dtype is None:
        out_dtype = xs[0].dtype

    align = _sublane_align(*( [x.dtype for x in xs] + [out_dtype] ))
    if batch_tile is None:
        batch_tile = _choose_batch_tile(B, align)
    batch_tile = max(align, _round_up(min(batch_tile, _round_up(B, align)), align))

    B_pad = _round_up(B, batch_tile)
    if B_pad != B:  # small tail remainder only; auto tiling keeps this near-minimal
        xs = [jnp.pad(x, ((0, B_pad - B), (0, 0))) for x in xs]
    grid = (B_pad // batch_tile,)

    w1_list, rest_w, biases, out_pads = prepare_params(
        params, xdims, lane_pad=lane_pad, compute_dtype=compute_dtype,
        split_first=split_first)
    out_pad = out_pads[-1]

    num_inputs = len(xs)
    num_layers = len(params)
    kernel = _make_mlp_kernel(num_inputs, num_layers, tuple(out_pads), compute_dtype)

    def full_spec(a):
        # Tiny parameter tensors stay fully resident in VMEM.
        return pl.BlockSpec(a.shape, lambda i: (0, 0))

    in_specs, operands = [], []
    for x, d in zip(xs, xdims):
        in_specs.append(pl.BlockSpec((batch_tile, d), lambda i: (i, 0)))
        operands.append(x)
    for w in w1_list:
        in_specs.append(full_spec(w))
        operands.append(w)
    in_specs.append(full_spec(biases))
    operands.append(biases)
    for w in rest_w:
        in_specs.append(full_spec(w))
        operands.append(w)

    # VMEM is not a constraint at these sizes; only raise the scoped limit for very
    # large user-supplied tiles (matters on v5e's 16 MiB default scoped VMEM).
    vmem_limit = (64 << 20) if batch_tile > 4096 else None
    compiler_params = pltpu.CompilerParams(
        dimension_semantics=("parallel",),
        vmem_limit_bytes=vmem_limit)

    y = pl.pallas_call(
        kernel,
        out_shape=jax.ShapeDtypeStruct((B_pad, out_pad), out_dtype),
        grid=grid,
        in_specs=in_specs,
        out_specs=pl.BlockSpec((batch_tile, out_pad), lambda i: (i, 0)),
        compiler_params=compiler_params,
    )(*operands)

    if unpad_output:
        return y[:B, :dim_output]
    return y  # padded (B_pad, out_pad); consumer fuses the slice


def init_params(key, input_size, layers, dim_output):
    """nn.Linear-style init (uniform +-1/sqrt(fan_in)); W stored [D_in, D_out]."""
    d_in = int(sum(input_size))
    sizes = list(layers) + [dim_output]
    params = []
    for d_out in sizes:
        key, kw, kb = jax.random.split(key, 3)
        bound = 1.0 / np.sqrt(d_in)
        w = jax.random.uniform(kw, (d_in, d_out), jnp.float32, -bound, bound)
        b = jax.random.uniform(kb, (1, d_out), jnp.float32, -bound, bound)
        params.append((w, b))
        d_in = d_out
    return params


def reference_forward(x_list, params):
    """Plain-JAX f32 reference (same math as the PyTorch module)."""
    h = jnp.concatenate([x.astype(jnp.float32) for x in x_list], axis=-1)
    for (w, b) in params[:-1]:
        h = jax.nn.relu(jnp.dot(h, w, precision=jax.lax.Precision.HIGHEST) + b)
    w, b = params[-1]
    return jnp.dot(h, w, precision=jax.lax.Precision.HIGHEST) + b


if __name__ == "__main__":
    key = jax.random.PRNGKey(0)

    # --- Config A: small feature dims -> concat path (single K=32 first matmul) ---
    input_size = (16, 16)
    layers = (64, 64)
    dim_output = 32
    key, kp = jax.random.split(key)
    params = init_params(kp, input_size, layers, dim_output)

    # Case 1: tiny batch, single grid step (bf16 MXU operands, f32 accumulation).
    batch = 16
    key, k1, k2 = jax.random.split(key, 3)
    x_list = [jax.random.normal(k1, (batch, input_size[0]), jnp.float32),
              jax.random.normal(k2, (batch, input_size[1]), jnp.float32)]
    y_ref = reference_forward(x_list, params)
    y = jax.block_until_ready(
        rnd_predictor_forward(x_list, params, dim_output=dim_output))
    np.testing.assert_allclose(np.asarray(y), np.asarray(y_ref), rtol=3e-2, atol=3e-2)

    # Same case, f32 compute (tighter check of layout / padding / bias packing).
    y32 = jax.block_until_ready(
        rnd_predictor_forward(x_list, params, dim_output=dim_output,
                              compute_dtype=jnp.float32))
    np.testing.assert_allclose(np.asarray(y32), np.asarray(y_ref), rtol=1e-2, atol=1e-2)

    # Case 2: odd batch -> auto tiling gives an even, balanced 2-tile grid (v7x cores
    # both busy) with only a tiny tail pad.
    batch2 = 520
    key, k1, k2 = jax.random.split(key, 3)
    x_list2 = [jax.random.normal(k1, (batch2, input_size[0]), jnp.float32),
               jax.random.normal(k2, (batch2, input_size[1]), jnp.float32)]
    y2_ref = reference_forward(x_list2, params)
    y2 = jax.block_until_ready(
        rnd_predictor_forward(x_list2, params, dim_output=dim_output))
    np.testing.assert_allclose(np.asarray(y2), np.asarray(y2_ref), rtol=3e-2, atol=3e-2)

    # Case 3: bf16 output writeback (halves the dominant HBM traffic of this tiny MLP).
    y2b = jax.block_until_ready(
        rnd_predictor_forward(x_list2, params, dim_output=dim_output,
                              out_dtype=jnp.bfloat16))
    np.testing.assert_allclose(np.asarray(y2b).astype(np.float32), np.asarray(y2_ref),
                               rtol=5e-2, atol=5e-2)

    # --- Config B: wide inputs (>128 total) -> split first matmul; mixed padded
    #     hidden widths, non-128 output dim, tail-padded multi-step grid. ---
    input_size_b = (96, 96)
    layers_b = (256, 96)
    dim_output_b = 7
    key, kpb = jax.random.split(key)
    params_b = init_params(kpb, input_size_b, layers_b, dim_output_b)
    batch3 = 200
    key, k1, k2 = jax.random.split(key, 3)
    x_list3 = [jax.random.normal(k1, (batch3, input_size_b[0]), jnp.float32),
               jax.random.normal(k2, (batch3, input_size_b[1]), jnp.float32)]
    y3_ref = reference_forward(x_list3, params_b)
    y3 = jax.block_until_ready(
        rnd_predictor_forward(x_list3, params_b, dim_output=dim_output_b,
                              compute_dtype=jnp.float32))
    np.testing.assert_allclose(np.asarray(y3), np.asarray(y3_ref), rtol=1e-2, atol=1e-2)

    print("KERNEL_OK")
</pallas_src>

<mosaic_0001>
module attributes {stable_mosaic.version = 11 : i64} {
  func.func @kernel(%arg0: i32, %arg1: memref<16x32xf32, #tpu.memory_space<vmem>>, %arg2: memref<32x128xbf16, #tpu.memory_space<vmem>>, %arg3: memref<8x128xf32, #tpu.memory_space<vmem>>, %arg4: memref<128x128xbf16, #tpu.memory_space<vmem>>, %arg5: memref<128x128xbf16, #tpu.memory_space<vmem>>, %arg6: memref<16x128xf32, #tpu.memory_space<vmem>>) attributes {dimension_semantics = [#tpu.dimension_semantics<parallel>], iteration_bounds = array<i64: 1>, scalar_prefetch = 0 : i64, scratch_operands = 0 : i64, tpu.core_type = #tpu.core_type<tc>, window_params = [{transform_indices = @transform_0, window_bounds = array<i64: 16, 32>}, {pipeline_mode = #tpu.pipeline_mode<synchronous>, transform_indices = @transform_1, window_bounds = array<i64: 32, 128>}, {pipeline_mode = #tpu.pipeline_mode<synchronous>, transform_indices = @transform_2, window_bounds = array<i64: 8, 128>}, {pipeline_mode = #tpu.pipeline_mode<synchronous>, transform_indices = @transform_3, window_bounds = array<i64: 128, 128>}, {pipeline_mode = #tpu.pipeline_mode<synchronous>, transform_indices = @transform_4, window_bounds = array<i64: 128, 128>}, {transform_indices = @transform_5, window_bounds = array<i64: 16, 128>}]} {
    %c0 = arith.constant 0 : index
    %c0_0 = arith.constant 0 : index
    %0 = vector.load %arg1[%c0, %c0_0] : memref<16x32xf32, #tpu.memory_space<vmem>>, vector<16x32xf32>
    %1 = arith.truncf %0 : vector<16x32xf32> to vector<16x32xbf16>
    %c0_1 = arith.constant 0 : index
    %c0_2 = arith.constant 0 : index
    %2 = vector.load %arg2[%c0_1, %c0_2] : memref<32x128xbf16, #tpu.memory_space<vmem>>, vector<32x128xbf16>
    %cst = arith.constant dense<0.000000e+00> : vector<16x128xf32>
    %3 = tpu.matmul %1, %2, %cst {dimension_numbers = #tpu.dot_dimension_numbers<[1], [0], [0], [1], [0, 0, 1, 1], [], []>} : vector<16x32xbf16>, vector<32x128xbf16>, vector<16x128xf32> -> vector<16x128xf32>
    %c0_3 = arith.constant 0 : index
    %c0_4 = arith.constant 0 : index
    %4 = vector.load %arg3[%c0_3, %c0_4] : memref<8x128xf32, #tpu.memory_space<vmem>>, vector<1x128xf32>
    %5 = vector.broadcast %4 : vector<1x128xf32> to vector<16x128xf32>
    %6 = arith.addf %3, %5 : vector<16x128xf32>
    %cst_5 = arith.constant 0.000000e+00 : f32
    %7 = vector.broadcast %cst_5 : f32 to vector<16x128xf32>
    %8 = arith.maximumf %6, %7 : vector<16x128xf32>
    %9 = arith.truncf %8 : vector<16x128xf32> to vector<16x128xbf16>
    %c0_6 = arith.constant 0 : index
    %c0_7 = arith.constant 0 : index
    %10 = vector.load %arg4[%c0_6, %c0_7] : memref<128x128xbf16, #tpu.memory_space<vmem>>, vector<128x128xbf16>
    %cst_8 = arith.constant dense<0.000000e+00> : vector<16x128xf32>
    %11 = tpu.matmul %9, %10, %cst_8 {dimension_numbers = #tpu.dot_dimension_numbers<[1], [0], [0], [1], [0, 0, 1, 1], [], []>} : vector<16x128xbf16>, vector<128x128xbf16>, vector<16x128xf32> -> vector<16x128xf32>
    %c1 = arith.constant 1 : index
    %c0_9 = arith.constant 0 : index
    %12 = vector.load %arg3[%c1, %c0_9] : memref<8x128xf32, #tpu.memory_space<vmem>>, vector<1x128xf32>
    %13 = vector.broadcast %12 : vector<1x128xf32> to vector<16x128xf32>
    %14 = arith.addf %11, %13 : vector<16x128xf32>
    %cst_10 = arith.constant 0.000000e+00 : f32
    %15 = vector.broadcast %cst_10 : f32 to vector<16x128xf32>
    %16 = arith.maximumf %14, %15 : vector<16x128xf32>
    %17 = arith.truncf %16 : vector<16x128xf32> to vector<16x128xbf16>
    %c0_11 = arith.constant 0 : index
    %c0_12 = arith.constant 0 : index
    %18 = vector.load %arg5[%c0_11, %c0_12] : memref<128x128xbf16, #tpu.memory_space<vmem>>, vector<128x128xbf16>
    %cst_13 = arith.constant dense<0.000000e+00> : vector<16x128xf32>
    %19 = tpu.matmul %17, %18, %cst_13 {dimension_numbers = #tpu.dot_dimension_numbers<[1], [0], [0], [1], [0, 0, 1, 1], [], []>} : vector<16x128xbf16>, vector<128x128xbf16>, vector<16x128xf32> -> vector<16x128xf32>
    %c2 = arith.constant 2 : index
    %c0_14 = arith.constant 0 : index
    %20 = vector.load %arg3[%c2, %c0_14] : memref<8x128xf32, #tpu.memory_space<vmem>>, vector<1x128xf32>
    %21 = vector.broadcast %20 : vector<1x128xf32> to vector<16x128xf32>
    %22 = arith.addf %19, %21 : vector<16x128xf32>
    %c0_15 = arith.constant 0 : index
    %c0_16 = arith.constant 0 : index
    %23 = vector.load %arg6[%c0_15, %c0_16] : memref<16x128xf32, #tpu.memory_space<vmem>>, vector<16x128xf32>
    tpu.vector_store %arg6[%c0_15, %c0_16], %22 {strides = array<i32>} : memref<16x128xf32, #tpu.memory_space<vmem>>, vector<16x128xf32>,
    return
  }
  func.func @transform_0(%arg0: i32) -> (i32, i32) {
    %c0_i32 = arith.constant 0 : i32
    %c0_i32_0 = arith.constant 0 : i32
    return %arg0, %c0_i32 : i32, i32
  }
  func.func @transform_1(%arg0: i32) -> (i32, i32) {
    %c0_i32 = arith.constant 0 : i32
    %c0_i32_0 = arith.constant 0 : i32
    %c0_i32_1 = arith.constant 0 : i32
    return %c0_i32, %c0_i32_0 : i32, i32
  }
  func.func @transform_2(%arg0: i32) -> (i32, i32) {
    %c0_i32 = arith.constant 0 : i32
    %c0_i32_0 = arith.constant 0 : i32
    %c0_i32_1 = arith.constant 0 : i32
    return %c0_i32, %c0_i32_0 : i32, i32
  }
  func.func @transform_3(%arg0: i32) -> (i32, i32) {
    %c0_i32 = arith.constant 0 : i32
    %c0_i32_0 = arith.constant 0 : i32
    %c0_i32_1 = arith.constant 0 : i32
    return %c0_i32, %c0_i32_0 : i32, i32
  }
  func.func @transform_4(%arg0: i32) -> (i32, i32) {
    %c0_i32 = arith.constant 0 : i32
    %c0_i32_0 = arith.constant 0 : i32
    %c0_i32_1 = arith.constant 0 : i32
    return %c0_i32, %c0_i32_0 : i32, i32
  }
  func.func @transform_5(%arg0: i32) -> (i32, i32) {
    %c0_i32 = arith.constant 0 : i32
    %c0_i32_0 = arith.constant 0 : i32
    return %arg0, %c0_i32 : i32, i32
  }
}

</mosaic_0001>

<bundles_post_ra>
// kernel: tpu_custom_call.1
= control target key start
LH: loop header
LB: loop body
LE: loop exit
PB: predicated region body
PF: predicated region fallthrough
CT: control target
= control target key end

     0   :  { %10 = vsyncpa [#allocation3], 0  ;;  %s818_s0 = inlined_call_operand.hbm [shape: f32[16,32], index: 0, kind: input, shape index: {}]   ;;  %s819_s1 = inlined_call_operand.hbm [shape: bf16[32,128], index: 1, kind: input, shape index: {}]   ;;  %s820_s2 = inlined_call_operand.hbm [shape: f32[8,128], index: 2, kind: input, shape index: {}]   ;;  %s821_s3 = inlined_call_operand.hbm [shape: bf16[128,128], index: 3, kind: input, shape index: {}]   ;;  %s822_s4 = inlined_call_operand.hbm [shape: bf16[128,128], index: 4, kind: input, shape index: {}]   ;;  %s823_s5 = inlined_call_operand.hbm [shape: f32[16,128], index: 5, kind: output, shape index: {}]  }
   0x1   :  { %11 = vsyncpa [#allocation6], 0 }
   0x2   :  { %12 = vsyncpa [#allocation9], 0 }
   0x3   :  { %13 = vsyncpa [#allocation4], 0  ;;  %s665_s18 = smov [#allocation5]   ;;  %s525_s22 = scalar_lea.hbm %s819_s1, 256 }
   0x4   :  { %s31_s19 = sshll.u32 %s665_s18, 4  ;;  %p526_p0 = scmp.ne.s32.totalorder %s819_s1, %s525_s22  ;;  %s32_s19 = int_to_ptr.vmem [resolvable:$true] %s31_s19 }
   0x5   :  { %p529_p1 = scmp.lt.u32.totalorder %s525_s22, %s819_s1 }
   0x7   :  { %p531_p2 = pnand %p529_p1, %p526_p0 }
   0x9   :  { %534 = shalt.err (!%p531_p2)
}
   0xa   :  { %s535_s27 = scalar_lea.vmem %s32_s19, 256  ;;  %p540_p4 = scmp.lt.s32.totalorder %s32_s19, %s32_s19 }
   0xb   :  { %p536_p3 = scmp.ne.s32.totalorder %s32_s19, %s535_s27  ;;  %p541_p5 = scmp.lt.s32.totalorder %s535_s27, %s535_s27 }
   0xd   :  { %p542_p6 = por %p541_p5, %p540_p4 }
   0xf   :  { %p543_p7 = pnand %p542_p6, %p536_p3 }
  0x11   :  { %546 = shalt.err (!%p543_p7)
}
  0x12   :  { %s666_s28 = smov 64   ;;  %s667_s29 = smov 4  }
  0x13   :  { %37 = dma.hbm_to_vmem [thread:$0]  %s819_s1, 256, %s32_s19, [#allocation6], %s666_s28, %s666_s28, %s667_s29  }
  0x14   :  { %s668_s7 = smov [#allocation8]   ;;  %s669_s9 = smov [#allocation2]  }
  0x15   :  { %s53_s8 = sshll.u32 %s668_s7, 4  ;;  %s19_s10 = sshll.u32 %s669_s9, 4  ;;  %s54_s8 = int_to_ptr.vmem [resolvable:$true] %s53_s8  ;;  %s20_s10 = int_to_ptr.vmem [resolvable:$true] %s19_s10 }
  0x16   :  { %s547_s13 = scalar_lea.hbm %s821_s3, 1024 }
  0x17   :  { %p548_p8 = scmp.ne.s32.totalorder %s821_s3, %s547_s13  ;;  %p551_p9 = scmp.lt.u32.totalorder %s547_s13, %s821_s3 }
  0x19   :  { %p553_p10 = pnand %p551_p9, %p548_p8 }
  0x1b   :  { %556 = shalt.err (!%p553_p10)
}
  0x1c   :  { %s557_s1 = scalar_lea.vmem %s54_s8, 1024  ;;  %p562_p12 = scmp.lt.s32.totalorder %s54_s8, %s54_s8 }
  0x1d   :  { %p558_p11 = scmp.ne.s32.totalorder %s54_s8, %s557_s1  ;;  %p563_p13 = scmp.lt.s32.totalorder %s557_s1, %s557_s1 }
  0x1f   :  { %p564_p0 = por %p563_p13, %p562_p12 }
  0x21   :  { %p565_p1 = pnand %p564_p0, %p558_p11 }
  0x23   :  { %568 = shalt.err (!%p565_p1)
}
  0x24   :  { %59 = dma.hbm_to_vmem [thread:$0]  %s821_s3, 1024, %s54_s8, [#allocation9], %s666_s28, %s666_s28, %s667_s29  }
  0x25   :  { %s569_s22 = scalar_lea.hbm %s818_s0, 256 }
  0x26   :  { %p570_p2 = scmp.ne.s32.totalorder %s818_s0, %s569_s22  ;;  %p573_p3 = scmp.lt.u32.totalorder %s569_s22, %s818_s0 }
  0x28   :  { %p575_p4 = pnand %p573_p3, %p570_p2 }
  0x2a   :  { %578 = shalt.err (!%p575_p4)
}
  0x2b   :  { %s579_s27 = scalar_lea.vmem %s20_s10, 256  ;;  %p584_p6 = scmp.lt.s32.totalorder %s20_s10, %s20_s10 }
  0x2c   :  { %p580_p5 = scmp.ne.s32.totalorder %s20_s10, %s579_s27  ;;  %p585_p7 = scmp.lt.s32.totalorder %s579_s27, %s579_s27 }
  0x2e   :  { %p586_p8 = por %p585_p7, %p584_p6 }
  0x30   :  { %p587_p9 = pnand %p586_p8, %p580_p5 }
  0x32   :  { %590 = shalt.err (!%p587_p9)
}
  0x33   :  { %s670_s3 = smov 128   ;;  %s671_s30 = smov 8  }
  0x34   :  { %25 = dma.hbm_to_vmem [thread:$0]  %s818_s0, 256, %s20_s10, [#allocation3], %s670_s3, %s670_s3, %s671_s30  }
  0x35   :  { %s672_s8 = smov [#allocation7]   ;;  %s673_s11 = smov [#allocation10]  }
  0x36   :  { %s44_s9 = sshll.u32 %s672_s8, 4  ;;  %s65_s12 = sshll.u32 %s673_s11, 4  ;;  %s45_s9 = int_to_ptr.vmem [resolvable:$true] %s44_s9  ;;  %s66_s12 = int_to_ptr.vmem [resolvable:$true] %s65_s12 }
  0x37   :  { %s591_s15 = scalar_lea.hbm %s820_s2, 128 }
  0x38   :  { %p592_p10 = scmp.ne.s32.totalorder %s820_s2, %s591_s15  ;;  %p595_p11 = scmp.lt.u32.totalorder %s591_s15, %s820_s2 }
  0x3a   :  { %p597_p12 = pnand %p595_p11, %p592_p10 }
  0x3c   :  { %600 = shalt.err (!%p597_p12)
}
  0x3d   :  { %s601_s0 = scalar_lea.vmem %s45_s9, 128  ;;  %p606_p0 = scmp.lt.s32.totalorder %s45_s9, %s45_s9 }
  0x3e   :  { %p602_p13 = scmp.ne.s32.totalorder %s45_s9, %s601_s0  ;;  %p607_p1 = scmp.lt.s32.totalorder %s601_s0, %s601_s0 }
  0x40   :  { %p608_p2 = por %p607_p1, %p606_p0 }
  0x42   :  { %p609_p3 = pnand %p608_p2, %p602_p13 }
  0x44   :  { %612 = shalt.err (!%p609_p3)
}
  0x45   :  { %47 = dma.hbm_to_vmem [thread:$0]  %s820_s2, 128, %s45_s9, [#allocation6]  }
  0x46   :  { %s613_s22 = scalar_lea.hbm %s822_s4, 1024 }
  0x47   :  { %p614_p4 = scmp.ne.s32.totalorder %s822_s4, %s613_s22  ;;  %p617_p5 = scmp.lt.u32.totalorder %s613_s22, %s822_s4 }
  0x49   :  { %p619_p6 = pnand %p617_p5, %p614_p4 }
  0x4b   :  { %622 = shalt.err (!%p619_p6)
}
  0x4c   :  { %s623_s27 = scalar_lea.vmem %s66_s12, 1024  ;;  %p628_p8 = scmp.lt.s32.totalorder %s66_s12, %s66_s12 }
  0x4d   :  { %p624_p7 = scmp.ne.s32.totalorder %s66_s12, %s623_s27  ;;  %p629_p9 = scmp.lt.s32.totalorder %s623_s27, %s623_s27 }
  0x4f   :  { %p630_p10 = por %p629_p9, %p628_p8 }
  0x51   :  { %p631_p11 = pnand %p630_p10, %p624_p7 }
  0x53   :  { %634 = shalt.err (!%p631_p11)
}
  0x54   :  { %71 = dma.hbm_to_vmem [thread:$0]  %s822_s4, 1024, %s66_s12, [#allocation9], %s666_s28, %s666_s28, %s667_s29  }
  0x55   :  { %657 = dma.done.wait [#allocation3], 256  }
  0x56   :  { %658 = vsyncadd [#allocation3], 4294967040 }
  0x57   :  { %659 = dma.done.wait [#allocation6], 384  }
  0x58   :  { %660 = vsyncadd [#allocation6], 4294966912 }
  0x59   :  { %661 = dma.done.wait [#allocation9], 2048  }
  0x5a   :  { %662 = vsyncadd [#allocation9], 4294965248  ;;  %v674_v0 = vmov 0.0   ;;  %vm675_vm0 = vmmov 0   ;;  %v507_v1 = vld [vmem:[#allocation5] sm:$0xff]   ;;  %v508_v2 = vld [vmem:[#allocation5 + $0x8] sm:$0xff]  }
  0x5b   :  { %447 = vmatprep.subr.bf16.mxu0 %v674_v0  ;;  %451 = vmatprep.mubr.msk.bf16.mxu0 %vm675_vm0, %v674_v0  ;;  %v88_v3 = vld [vmem:[#allocation2] sm:$0xff]  ;;  %v89_v4 = vld [vmem:[#allocation2 + $0x8] sm:$0xff]  ;;  %v510_v7 = vld [vmem:[#allocation8 + $0x8] sm:$0xff]   ;;  %vm112_vm1 = vcmask 261120   ;;  %s676_s4 = smov [#allocation11]  }
  0x5c   :  { %455 = vmatprep.subr.bf16.mxu1 %v674_v0  ;;  %471 = vmatprep.mubr.msk.bf16.mxu1 %vm675_vm0, %v674_v0  ;;  %v509_v5 = vld [vmem:[#allocation8] sm:$0xff]   ;;  %v90_v6 = vpack.c.bf16 %v89_v4, %v88_v3  ;;  %v511_v8 = vld [vmem:[#allocation8 + $0x10] sm:$0xff]   ;;  %v512_v9 = vld [vmem:[#allocation8 + $0x18] sm:$0xff]   ;;  %s390_s28 = sshll.u32 %s676_s4, 4  ;;  %s391_s28 = int_to_ptr.vmem [resolvable:$true] %s390_s28 }
  0x5d   :  { %448 = vmatpush3.bf16.msra.mxu0 %v507_v1  ;;  %456 = vmatpush3.bf16.msra.mxu1 %v509_v5  ;;  %v513_v10 = vld [vmem:[#allocation8 + $0x20] sm:$0xff]   ;;  %v514_v11 = vld [vmem:[#allocation8 + $0x28] sm:$0xff]   ;;  %v515_v12 = vld [vmem:[#allocation8 + $0x30] sm:$0xff]   ;;  %s635_s29 = scalar_lea.vmem %s391_s28, 256  ;;  %p640_p13 = scmp.lt.s32.totalorder %s391_s28, %s391_s28 }
  0x5e   :  { %449 = vmatprep.subr.bf16.mxu0 %v674_v0  ;;  %457 = vmatprep.subr.bf16.mxu1 %v674_v0  ;;  %v516_v13 = vld [vmem:[#allocation8 + $0x38] sm:$0xff]   ;;  %v517_v14 = vld [vmem:[#allocation10] sm:$0xff]   ;;  %v518_v15 = vld [vmem:[#allocation10 + $0x8] sm:$0xff]   ;;  %p636_p12 = scmp.ne.s32.totalorder %s391_s28, %s635_s29  ;;  %p641_p0 = scmp.lt.s32.totalorder %s635_s29, %s635_s29 }
  0x5f   :  { %v519_v16 = vld [vmem:[#allocation10 + $0x10] sm:$0xff]   ;;  %v520_v17 = vld [vmem:[#allocation10 + $0x18] sm:$0xff]   ;;  %v521_v18 = vld [vmem:[#allocation10 + $0x20] sm:$0xff]  }
  0x60   :  { %v522_v19 = vld [vmem:[#allocation10 + $0x28] sm:$0xff]   ;;  %v404_v20 = vld [vmem:[#allocation7] ss:$0 sm:$0xff]  ;;  %v523_v30 = vld [vmem:[#allocation10 + $0x30] sm:$0xff]   ;;  %p642_p1 = por %p641_p0, %p640_p13 }
  0x61   :  { %450 = vmatpush3.bf16.msra.mxu0 %v508_v2  ;;  %458 = vmatpush3.bf16.msra.mxu1 %v510_v7  ;;  %v524_v31 = vld [vmem:[#allocation10 + $0x38] sm:$0xff]  }
  0x62   :  { %475 = vmatprep.subr.bf16.mxu0 %v674_v0  ;;  %459 = vmatprep.subr.bf16.mxu1 %v674_v0  ;;  %v408_v32 = vld [vmem:[#allocation7 + $0x1] ss:$0 sm:$0xff]  ;;  %v417_v42 = vld [vmem:[#allocation7 + $0x2] ss:$0 sm:$0xff]  ;;  %p643_p2 = pnand %p642_p1, %p636_p12 }
  0x64   :  { %452 = vmatmul.mubr.msk.bf16.vlgmr.msra.gmra.mrb[0].mxu0 %vm112_vm1, %v90_v6 }
  0x65   :  { %491 = vmatprep.mubr.msk.bf16.mxu0 %vm675_vm0, %v674_v0  ;;  %460 = vmatpush3.bf16.msra.mxu1 %v511_v8 }
  0x66   :  { %461 = vmatprep.subr.bf16.mxu1 %v674_v0  ;;  %476 = vmatpush3.bf16.msra.mxu0 %v517_v14 }
  0x67   :  { %477 = vmatprep.subr.bf16.mxu0 %v674_v0 }
  0x69   :  { %462 = vmatpush3.bf16.msra.mxu1 %v512_v9 }
  0x6a   :  { %463 = vmatprep.subr.bf16.mxu1 %v674_v0  ;;  %478 = vmatpush3.bf16.msra.mxu0 %v518_v15 }
  0x6b   :  { %479 = vmatprep.subr.bf16.mxu0 %v674_v0 }
  0x6d   :  { %464 = vmatpush3.bf16.msra.mxu1 %v513_v10 }
  0x6e   :  { %465 = vmatprep.subr.bf16.mxu1 %v674_v0  ;;  %480 = vmatpush3.bf16.msra.mxu0 %v519_v16 }
  0x6f   :  { %481 = vmatprep.subr.bf16.mxu0 %v674_v0 }
  0x71   :  { %466 = vmatpush3.bf16.msra.mxu1 %v514_v11 }
  0x72   :  { %467 = vmatprep.subr.bf16.mxu1 %v674_v0  ;;  %482 = vmatpush3.bf16.msra.mxu0 %v520_v17 }
  0x73   :  { %483 = vmatprep.subr.bf16.mxu0 %v674_v0 }
  0x75   :  { %468 = vmatpush3.bf16.msra.mxu1 %v515_v12 }
  0x76   :  { %469 = vmatprep.subr.bf16.mxu1 %v674_v0  ;;  %484 = vmatpush3.bf16.msra.mxu0 %v521_v18 }
  0x77   :  { %485 = vmatprep.subr.bf16.mxu0 %v674_v0 }
  0x79   :  { %470 = vmatpush3.bf16.msra.mxu1 %v516_v13 }
  0x7a   :  { %486 = vmatpush3.bf16.msra.mxu0 %v522_v19 }
  0x7b   :  { %487 = vmatprep.subr.bf16.mxu0 %v674_v0 }
  0x7e   :  { %488 = vmatpush3.bf16.msra.mxu0 %v523_v30 }
  0x7f   :  { %489 = vmatprep.subr.bf16.mxu0 %v674_v0 }
  0x82   :  { %490 = vmatpush3.bf16.msra.mxu0 %v524_v31 }
 0x137   :  { %v150_v21 = vpop.f32.mrb[0].mxu0 }
 0x138   :  { %v151_v22 = vadd.f32 %v404_v20, %v150_v21  ;;  %v453_v23 = vpop.f32.mrb[1].mxu0 }
 0x139   :  { %v153_v24 = vpop.f32.mrb[2].mxu0 }
 0x13a   :  { %v154_v25 = vadd.f32 %v404_v20, %v153_v24  ;;  %v454_v26 = vpop.f32.mrb[3].mxu0  ;;  %v157_v27 = vmax.f32 %v151_v22, 0.0 }
 0x13c   :  { %v158_v28 = vmax.f32 %v154_v25, 0.0 }
 0x13e   :  { %v159_v29 = vpack.c.bf16 %v158_v28, %v157_v27 }
 0x140   :  { %472 = vmatmul.mubr.bf16.vlgmr.msra.gmra.mrb[0].mxu1 %v159_v29 }
 0x213   :  { %v263_v33 = vpop.f32.mrb[0].mxu1 }
 0x214   :  { %v264_v34 = vadd.f32 %v408_v32, %v263_v33  ;;  %v473_v35 = vpop.f32.mrb[1].mxu1 }
 0x215   :  { %v266_v36 = vpop.f32.mrb[2].mxu1 }
 0x216   :  { %v267_v37 = vadd.f32 %v408_v32, %v266_v36  ;;  %v474_v38 = vpop.f32.mrb[3].mxu1  ;;  %v270_v39 = vmax.f32 %v264_v34, 0.0 }
 0x218   :  { %v271_v40 = vmax.f32 %v267_v37, 0.0 }
 0x21a   :  { %v272_v41 = vpack.c.bf16 %v271_v40, %v270_v39 }
 0x21c   :  { %492 = vmatmul.mubr.bf16.vlgmr.msra.gmra.mrb[4].mxu0 %v272_v41 }
 0x2ef   :  { %v376_v43 = vpop.f32.mrb[4].mxu0 }
 0x2f0   :  { %v377_v44 = vadd.f32 %v417_v42, %v376_v43  ;;  %v493_v45 = vpop.f32.mrb[5].mxu0 }
 0x2f1   :  { %v379_v46 = vpop.f32.mrb[6].mxu0 }
 0x2f2   :  { %383 = vst [vmem:[#allocation11] sm:$0xff] %v377_v44  ;;  %v380_v47 = vadd.f32 %v417_v42, %v379_v46  ;;  %v494_v48 = vpop.f32.mrb[7].mxu0 }
 0x2f4   :  { %384 = vst [vmem:[#allocation11 + $0x8] sm:$0xff] %v380_v47 }
 0x2f5   :  { %646 = shalt.err (!%p643_p2)
}
 0x2f6   :  { %s647_s9 = scalar_lea.hbm %s823_s5, 256 }
 0x2f7   :  { %p648_p3 = scmp.ne.s32.totalorder %s823_s5, %s647_s9  ;;  %p651_p4 = scmp.lt.u32.totalorder %s647_s9, %s823_s5 }
 0x2f9   :  { %p653_p5 = pnand %p651_p4, %p648_p3 }
 0x2fb   :  { %656 = shalt.err (!%p653_p5)
}
 0x2fc   :  { %396 = dma.vmem_to_hbm [thread:$0]  %s391_s28, 256, %s823_s5, [#allocation4], %s670_s3, %s670_s3, %s671_s30  }
 0x2fd   :  { %663 = dma.done.wait [#allocation4], 256  }
 0x2fe   :  { %664 = vsyncadd [#allocation4], 4294967040 }
 0x2ff   :  { %400 = vsyncpa [#allocation3], 1 }
 0x300   :  { %401 = vsyncpa [#allocation6], 1 }
 0x301   :  { %402 = vsyncpa [#allocation9], 1 }
 0x302   :  { %403 = vsyncpa [#allocation4], 1 }

</bundles_post_ra>
